<compile_context>
chip_gen: v7x
topology: tpu7x:2x2x1
jax: 0.10.0
libtpu: 0.0.40
codegen_flags: <defaults>
</compile_context>

<pallas_src>
import jax
import jax.numpy as jnp
from jax.experimental import pallas as pl
from jax.experimental.pallas import tpu as pltpu


_PACK = 128                      # samples packed per lane-dense row
_VMEM_BUDGET = 4 * 1024 * 1024   # target bytes per (single) input buffer
_VMEM_LIMIT = 32 * 1024 * 1024   # scoped VMEM limit, safe on v5e/v6e/v7x


def _cdiv(a, b):
    return (a + b - 1) // b


def _round_up(a, m):
    return _cdiv(a, m) * m


# ---------------------------------------------------------------------------
# Lane-dense packed path (small dim_in, the neural-PDE case).
# ---------------------------------------------------------------------------
def _packed_kernel(xf_ref, wbd_ref, b_ref, o_ref):
    # xf_ref : (TQ, 128*D) tile, each row = 128 samples x D features (lane dense)
    # wbd_ref: (128*D, 128) block-structured weights: wbd[p*D + j, p] = w[j]
    # b_ref  : (1,) scalar bias in SMEM
    # o_ref  : (TQ, 128) lane-dense output tile (sample 128*q + lane)
    acc = jnp.dot(xf_ref[...], wbd_ref[...],
                  preferred_element_type=jnp.float32)       # MXU reduction
    o_ref[...] = jnp.tanh(acc + b_ref[0]).astype(o_ref.dtype)


def _packed_weighted_sum(x, w, b, *, block_samples):
    n, d = x.shape
    row_elems = _PACK * d
    rows = _cdiv(n, _PACK)

    # Sublane-aligned tile of packed rows, sized from the VMEM budget.
    tile = max(8, (max(1, block_samples // _PACK) // 8) * 8)
    rows_p = _round_up(rows, 8)
    if tile >= rows_p:
        tile = rows_p                        # single full-extent block
    else:
        rows_p = _round_up(rows_p, tile)
    n_pad = rows_p * _PACK

    x_pad = jnp.pad(x, ((0, n_pad - n), (0, 0)))
    xf = x_pad.reshape(rows_p, row_elems)    # lane-dense packing (free reshape)

    # Block-structured weight matrix: column p picks out sample p of a row.
    eye = jnp.eye(_PACK, dtype=x.dtype)
    w_bd = (eye[:, None, :] * w.astype(x.dtype)[None, :, None]).reshape(
        row_elems, _PACK)

    b1 = jnp.asarray(b, dtype=jnp.float32).reshape(1)

    out = pl.pallas_call(
        _packed_kernel,
        out_shape=jax.ShapeDtypeStruct((rows_p, _PACK), x.dtype),
        grid_spec=pltpu.PrefetchScalarGridSpec(
            num_scalar_prefetch=0,
            grid=(rows_p // tile,),
            in_specs=[
                pl.BlockSpec((tile, row_elems), lambda q: (q, 0)),   # x tile
                pl.BlockSpec((row_elems, _PACK), lambda q: (0, 0)),  # weights
                pl.BlockSpec(memory_space=pltpu.MemorySpace.SMEM),   # bias
            ],
            out_specs=pl.BlockSpec((tile, _PACK), lambda q: (q, 0)),
        ),
        compiler_params=pltpu.CompilerParams(
            dimension_semantics=("parallel",),
            vmem_limit_bytes=_VMEM_LIMIT,
        ),
    )(xf, w_bd, b1)

    return out.reshape(n_pad, 1)[:n]


# ---------------------------------------------------------------------------
# Row-tiled fallback path (large dim_in).
# ---------------------------------------------------------------------------
def _rows_kernel(x_ref, w_ref, b_ref, o_ref):
    # x_ref: (TM, D), w_ref: (1, D), b_ref: (1,) SMEM, o_ref: (TM, 1)
    x = x_ref[...].astype(jnp.float32)
    w = w_ref[...].astype(jnp.float32)
    s = jnp.sum(x * w, axis=-1, keepdims=True) + b_ref[0]
    o_ref[...] = jnp.tanh(s).astype(o_ref.dtype)


def _rows_weighted_sum(x, w, b, *, block_rows):
    n, d = x.shape
    tile = max(8, (max(1, block_rows) // 8) * 8)
    n_pad = _round_up(n, 8)
    if tile >= n_pad:
        tile = n_pad
    else:
        n_pad = _round_up(n_pad, tile)

    x_pad = jnp.pad(x, ((0, n_pad - n), (0, 0)))
    w2 = w.reshape(1, d).astype(x.dtype)
    b1 = jnp.asarray(b, dtype=jnp.float32).reshape(1)

    out = pl.pallas_call(
        _rows_kernel,
        out_shape=jax.ShapeDtypeStruct((n_pad, 1), x.dtype),
        grid_spec=pltpu.PrefetchScalarGridSpec(
            num_scalar_prefetch=0,
            grid=(n_pad // tile,),
            in_specs=[
                pl.BlockSpec((tile, d), lambda i: (i, 0)),           # x tile
                pl.BlockSpec((1, d), lambda i: (0, 0)),              # weights
                pl.BlockSpec(memory_space=pltpu.MemorySpace.SMEM),   # bias
            ],
            out_specs=pl.BlockSpec((tile, 1), lambda i: (i, 0)),
        ),
        compiler_params=pltpu.CompilerParams(
            dimension_semantics=("parallel",),
            vmem_limit_bytes=_VMEM_LIMIT,
        ),
    )(x_pad, w2, b1)
    return out[:n]


def weighted_sum_nonlinear(x, w, b, *, block_samples=None):
    """y = tanh(x @ w + b).  x: (N, dim_in), w: (dim_in,), b: () -> (N, 1).

    Works for any N (zero-padded internally) and any dtype (f32 / bf16 input;
    f32 accumulation).  `block_samples` overrides the per-grid-step tile size.
    """
    n, d = x.shape
    itemsize = jnp.dtype(x.dtype).itemsize
    if block_samples is None:
        block_samples = max(_PACK, _VMEM_BUDGET // max(1, d * itemsize))
    # Lane-dense packed path while the block-structured weight matrix stays
    # small (dim_in <= 64 at f32); otherwise the plain row-tiled path.
    if _PACK * d * _PACK * itemsize <= _VMEM_BUDGET:
        return _packed_weighted_sum(x, w, b, block_samples=block_samples)
    return _rows_weighted_sum(x, w, b, block_rows=block_samples)


if __name__ == "__main__":
    key = jax.random.PRNGKey(0)
    kx, kw, kb, kx2, kw2 = jax.random.split(key, 5)

    def ref(x, w, b):
        return jnp.tanh(jnp.sum(x * w[None, :], axis=-1, keepdims=True) + b)

    # MXU f32 matmuls may run as bf16 passes depending on default matmul
    # precision, so the packed path is checked at a few-1e-3 tolerance.
    TOL = dict(atol=2e-3, rtol=2e-3)

    # Small neural-PDE-like shapes: N collocation points, dim_in = 8.
    N, DIM_IN = 2048, 8
    x = jax.random.normal(kx, (N, DIM_IN), dtype=jnp.float32)
    w = jax.random.normal(kw, (DIM_IN,), dtype=jnp.float32) * 0.1
    b = jax.random.normal(kb, (), dtype=jnp.float32) * 0.1

    # 1) Lane-dense packed path with several grid steps (block_samples < N).
    out = jax.block_until_ready(
        weighted_sum_nonlinear(x, w, b, block_samples=1024))
    assert out.shape == (N, 1)
    assert jnp.allclose(out, ref(x, w, b), **TOL)

    # 2) N not a multiple of 128 (zero-pad path), default tile size.
    x_odd = x[:300]
    out_odd = jax.block_until_ready(weighted_sum_nonlinear(x_odd, w, b))
    assert out_odd.shape == (300, 1)
    assert jnp.allclose(out_odd, ref(x_odd, w, b), **TOL)

    # 3) Large dim_in -> row-tiled fallback path (exact f32 VPU reduce).
    N3, D3 = 192, 256
    x3 = jax.random.normal(kx2, (N3, D3), dtype=jnp.float32)
    w3 = jax.random.normal(kw2, (D3,), dtype=jnp.float32) * 0.05
    out3 = jax.block_until_ready(weighted_sum_nonlinear(x3, w3, b))
    assert out3.shape == (N3, 1)
    assert jnp.allclose(out3, ref(x3, w3, b), atol=1e-5, rtol=1e-5)

    print("KERNEL_OK")
</pallas_src>

<mosaic_0001>
module attributes {stable_mosaic.version = 11 : i64} {
  func.func @_packed_kernel(%arg0: i32, %arg1: memref<8x1024xf32, #tpu.memory_space<vmem>>, %arg2: memref<1024x128xf32, #tpu.memory_space<vmem>>, %arg3: memref<1xf32, #tpu.memory_space<smem>>, %arg4: memref<8x128xf32, #tpu.memory_space<vmem>>) attributes {dimension_semantics = [#tpu.dimension_semantics<parallel>], iteration_bounds = array<i64: 2>, scalar_prefetch = 0 : i64, scratch_operands = 0 : i64, tpu.core_type = #tpu.core_type<tc>, window_params = [{transform_indices = @transform_0, window_bounds = array<i64: 8, 1024>}, {pipeline_mode = #tpu.pipeline_mode<synchronous>, transform_indices = @transform_1, window_bounds = array<i64: 1024, 128>}, {transform_indices = @transform_2, window_bounds = array<i64: 1>}, {transform_indices = @transform_3, window_bounds = array<i64: 8, 128>}]} {
    %c0 = arith.constant 0 : index
    %c0_0 = arith.constant 0 : index
    %0 = vector.load %arg1[%c0, %c0_0] : memref<8x1024xf32, #tpu.memory_space<vmem>>, vector<8x1024xf32>
    %c0_1 = arith.constant 0 : index
    %c0_2 = arith.constant 0 : index
    %1 = vector.load %arg2[%c0_1, %c0_2] : memref<1024x128xf32, #tpu.memory_space<vmem>>, vector<1024x128xf32>
    %cst = arith.constant dense<0.000000e+00> : vector<8x128xf32>
    %2 = tpu.matmul %0, %1, %cst {dimension_numbers = #tpu.dot_dimension_numbers<[1], [0], [0], [1], [0, 0, 1, 1], [], []>} : vector<8x1024xf32>, vector<1024x128xf32>, vector<8x128xf32> -> vector<8x128xf32>
    %c0_3 = arith.constant 0 : index
    %3 = memref.load %arg3[%c0_3] : memref<1xf32, #tpu.memory_space<smem>>
    %4 = vector.broadcast %3 : f32 to vector<8x128xf32>
    %5 = arith.addf %2, %4 : vector<8x128xf32>
    %6 = math.tanh %5 : vector<8x128xf32>
    %c0_4 = arith.constant 0 : index
    %c0_5 = arith.constant 0 : index
    %7 = vector.load %arg4[%c0_4, %c0_5] : memref<8x128xf32, #tpu.memory_space<vmem>>, vector<8x128xf32>
    tpu.vector_store %arg4[%c0_4, %c0_5], %6 {strides = array<i32>} : memref<8x128xf32, #tpu.memory_space<vmem>>, vector<8x128xf32>,
    return
  }
  func.func @transform_0(%arg0: i32) -> (i32, i32) {
    %c0_i32 = arith.constant 0 : i32
    %c0_i32_0 = arith.constant 0 : i32
    return %arg0, %c0_i32 : i32, i32
  }
  func.func @transform_1(%arg0: i32) -> (i32, i32) {
    %c0_i32 = arith.constant 0 : i32
    %c0_i32_0 = arith.constant 0 : i32
    %c0_i32_1 = arith.constant 0 : i32
    return %c0_i32, %c0_i32_0 : i32, i32
  }
  func.func @transform_2(%arg0: i32) -> i32 {
    %c0_i32 = arith.constant 0 : i32
    %c0_i32_0 = arith.constant 0 : i32
    return %c0_i32 : i32
  }
  func.func @transform_3(%arg0: i32) -> (i32, i32) {
    %c0_i32 = arith.constant 0 : i32
    %c0_i32_0 = arith.constant 0 : i32
    return %arg0, %c0_i32 : i32, i32
  }
}

</mosaic_0001>

<bundles_post_ra>
// kernel: tpu_custom_call.1
= control target key start
LH: loop header
LB: loop body
LE: loop exit
PB: predicated region body
PF: predicated region fallthrough
CT: control target
= control target key end

     0   :  { %s1427_s0 = inlined_call_operand.hbm [shape: f32[16,1024], index: 0, kind: input, shape index: {}]   ;;  %s1428_s1 = inlined_call_operand.hbm [shape: f32[1024,128], index: 1, kind: input, shape index: {}]   ;;  %s1429_s2 = inlined_call_operand.<no memory space> [shape: f32[1], index: 2, kind: input, shape index: {}]   ;;  %s1430_s3 = inlined_call_operand.hbm [shape: f32[16,128], index: 3, kind: output, shape index: {}]  }
   0x1   :  { %8 = sst [smem:[#allocation2]] %s1429_s2 }
   0x2   :  { %9 = vsyncpa [#allocation4], 0 }
   0x3   :  { %11 = vsyncpa [#allocation4 + $0x1], 0 }
   0x4   :  { %12 = vsyncpa [#allocation7], 0 }
   0x5   :  { %13 = vsyncpa [#allocation5], 0 }
   0x6   :  { %15 = vsyncpa [#allocation5 + $0x1], 0  ;;  %s1220_s14 = smov 0   ;;  %s1222_s15 = smov 0  }
   0x7   :  { %s1224_s16 = smov 0   ;;  %s1226_s17 = smov 0  }
   0x8 LB: > { %s1241_s2 = sadd.s32 4294967295, %s1190_s17   ;;  %s717_s18 = sadd.s32 4294967294, %s1190_s17   ;;  %s1190_s17 = sphi %s1226_s17, %s1450_s17   ;;  %s1186_s16 = sphi %s1224_s16, %s1449_s16   ;;  %s1182_s15 = sphi %s1222_s15, %s1448_s15   ;;  %s1178_s14 = sphi %s1220_s14, %s1447_s14  }
   0x9   : > { %p41_p0 = scmp.ne.s32.totalorder %s1182_s15, %s1178_s14  ;;  %p1431_p1 = scmp.eq.s32.totalorder %s1241_s2, 0 }
   0xa   : > { %p113_p3 = scmp.eq.s32.totalorder %s717_s18, 1  ;;  %p718_p5 = scmp.ge.s32.totalorder %s1190_s17, 1 }
   0xb   : > { %p1250_p4 = por %p1431_p1, %p41_p0  ;;  %p120_p7 = scmp.lt.s32.totalorder %s1190_s17, 3 }
   0xc   : > { %p1255_p6 = por %p113_p3, %p41_p0  ;;  %s1192_s22 = smov [#allocation6]  }
   0xd   : > { %s1434_s19 = scalar_select %p1250_p4, 1, 0 }
   0xe   : > { %s1435_s20 = scalar_select %p1255_p6, 1, 0 }
   0xf   : > { %p1260_p8 = pnand %p718_p5, %p120_p7  ;;  %s132_s23 = sshll.u32 %s1192_s22, 4  ;;  %s1264_s23 = int_to_ptr.vmem [resolvable:$true] %s132_s23 }
  0x10   : > { %s1276_s25 = sadd.s32 1, %s1190_s17   ;;  %s28_s26 = sadd.s32 1, %s1186_s16 }
  0x11   : > { %s1436_s21 = scalar_select %p1260_p8, 1, 0 }
  0x12   : > { %p1009_p9 = pneg %p1260_p8  ;;  %s25_s27 = ssub.s32 %s1190_s17, %s1276_s25 }
  0x13   : > { %s1062_s30 = scalar_lea.hbm %s1428_s1, 16384 }
  0x14   : > { %p1271_p11 = pnand %p1009_p9, %p1431_p1  ;;  %p1063_p12 = scmp.ne.s32.totalorder %s1428_s1, %s1062_s30 }
  0x15   : > { %p1069_p5 = scmp.lt.u32.totalorder %s1062_s30, %s1428_s1 }
  0x16   : > { %p1064_p13 = pneg %p1271_p11 }
  0x18   : > { %p1065_p0 = pnand %p1064_p13, %p1063_p12 }
  0x1a   : > { %p1066_p3 = pneg %p1065_p0 }
  0x1c   : > { %p1071_p7 = pnand %p1069_p5, %p1066_p3 }
  0x1e   : > { %1074 = shalt.err (!%p1071_p7)
}
  0x1f   : > { %s1075_s8 = scalar_lea.vmem %s1264_s23, 16384  ;;  %p1083_p2 = scmp.lt.s32.totalorder %s1264_s23, %s1264_s23 }
  0x20   : > { %p1076_p9 = scmp.ne.s32.totalorder %s1264_s23, %s1075_s8  ;;  %p1084_p6 = scmp.lt.s32.totalorder %s1075_s8, %s1075_s8 }
  0x22   : > { %p1078_p10 = pnand %p1076_p9, %p1064_p13  ;;  %p1085_p4 = por %p1084_p6, %p1083_p2 }
  0x24   : > { %p1079_p1 = pneg %p1078_p10 }
  0x26   : > { %p1086_p8 = pnand %p1085_p4, %p1079_p1 }
  0x28   : > { %1089 = shalt.err (!%p1086_p8)
}
  0x29   : > { %s1193_s9 = smov 128   ;;  %s1194_s10 = smov 8  }
  0x2a   : > { %1012 = dma.hbm_to_vmem [thread:$0]  (!%p1271_p11), %s1428_s1, 16384, %s1264_s23, [#allocation7], %s1193_s9, %s1193_s9, %s1194_s10  }
  0x2b   : > { %p26_p2 = scmp.eq.s32.totalorder %s25_s27, 0  ;;  %p35_p1 = scmp.ne.s32.totalorder %s1186_s16, %s1182_s15 }
  0x2c   : > { %p36_p4 = scmp.eq.s32.totalorder %s1190_s17, 0  ;;  %p1022_p6 = scmp.lt.s32.totalorder %s1190_s17, 2 }
  0x2d   : > { %s1307_s13 = scalar_select %p26_p2, %s1186_s16, %s28_s26  }
  0x2e   : > { %p37_p8 = por %p36_p4, %p35_p1  ;;  %p1438_p10 = scmp.eq.s32.totalorder %s1241_s2, 1 }
  0x2f   : > { %s149_s22 = sand.u32 1, %s1186_s16   ;;  %s732_s28 = sshll.u32 %s1190_s17, 10 }
  0x30   : > { %p1311_p12 = por %p1438_p10, %p35_p1  ;;  %s721_s29 = sshll.u32 %s149_s22, 6 }
  0x31   : > { %s1320_s4 = scalar_lea.hbm %s1427_s0, %s732_s28  ;;  %s153_s23 = scalar_lea.vmem [#allocation3], %s721_s29 }
  0x32   : > { %s161_s26 = sshll.u32 %s153_s23, 4  ;;  %p1322_p11 = pnand %p1022_p6, %p37_p8  ;;  %s1326_s26 = int_to_ptr.vmem [resolvable:$true] %s161_s26 }
  0x33   : > { %s150_s5 = scalar_lea.sflag [#allocation4], %s149_s22  ;;  %s1090_s6 = scalar_lea.hbm %s1320_s4, 1024 }
  0x34   : > { %p1091_p13 = scmp.ne.s32.totalorder %s1320_s4, %s1090_s6  ;;  %p1092_p0 = pneg %p1322_p11 }
  0x35   : > { %s1095_s9 = scalar_lea.hbm %s1427_s0, 2048  ;;  %p1096_p7 = scmp.lt.u32.totalorder %s1320_s4, %s1427_s0 }
  0x36   : > { %p1093_p3 = pnand %p1092_p0, %p1091_p13  ;;  %p1097_p9 = scmp.lt.u32.totalorder %s1095_s9, %s1090_s6 }
  0x37   : > { %p1099_p1 = scmp.lt.u32.totalorder %s1090_s6, %s1320_s4 }
  0x38   : > { %p1094_p5 = pneg %p1093_p3  ;;  %p1098_p2 = por %p1097_p9, %p1096_p7 }
  0x3a   : > { %p1100_p4 = por %p1099_p1, %p1098_p2 }
  0x3c   : > { %p1101_p6 = pnand %p1100_p4, %p1094_p5 }
  0x3e   : > { %1104 = shalt.err (!%p1101_p6)
}
  0x3f   : > { %s1105_s12 = scalar_lea.vmem %s1326_s26, 1024  ;;  %s1195_s22 = smov [#allocation3]  }
  0x40   : > { %p1106_p8 = scmp.ne.s32.totalorder %s1326_s26, %s1105_s12  ;;  %s1110_s28 = sshll.u32 %s1195_s22, 4  ;;  %s1111_s28 = int_to_ptr.vmem [resolvable:$false] %s1110_s28 }
  0x41   : > { %s1112_s29 = scalar_lea.vmem %s1111_s28, 2048  ;;  %p1113_p3 = scmp.lt.s32.totalorder %s1326_s26, %s1111_s28 }
  0x42   : > { %p1108_p10 = pnand %p1106_p8, %p1092_p0  ;;  %p1114_p7 = scmp.lt.s32.totalorder %s1112_s29, %s1105_s12 }
  0x44   : > { %p1109_p13 = pneg %p1108_p10  ;;  %p1115_p9 = por %p1114_p7, %p1113_p3 }
  0x46   : > { %p1116_p2 = pnand %p1115_p9, %p1109_p13 }
  0x48   : > { %1119 = shalt.err (!%p1116_p2)
}
  0x49   : > { %1016 = dma.hbm_to_vmem [thread:$0]  (!%p1322_p11), %s1320_s4, 1024, %s1326_s26, %s150_s5  }
  0x4a   : > { %p1441_p5 = scmp.ne.s32.totalorder %s1436_s21, 0 }
  0x4b   : > { %s1356_s24 = sand.u32 (!%p1441_p5), 1, %s1182_s15   ;;  %p1442_p0 = scmp.ne.s32.totalorder (!%p1441_p5), %s1434_s19, 0 }
  0x4c   : > { %170 = sbr.rel (%p1441_p5) target bundleno = 398 (0x18e), region = 32  ;;  %s725_s30 = sshll.u32 (!%p1441_p5), %s1356_s24, 6 }
  0x4d   : > { %s173_s23 = scalar_lea.sflag (!%p1441_p5), [#allocation4], %s1356_s24  ;;  %s1360_s6 = scalar_lea.vmem (!%p1441_p5), [#allocation3], %s725_s30 }
  0x53   : > { %1165 = dma.done.wait (%p1442_p0), %s173_s23, 1024  }
  0x54   : > { %1167 = vsyncadd (%p1442_p0), %s173_s23, 4294966272  ;;  %p1443_p11 = scmp.eq.s32.totalorder %s1241_s2, 0 }
  0x56   : > { %1169 = dma.done.wait (%p1443_p11), [#allocation7], 16384   ;;  %p1444_p1 = pmov %p1443_p11 }
  0x57   : > { %v227_v0 = vld [vmem:[#allocation6 + $0x80] sm:$0xff]  ;;  %v228_v1 = vld [vmem:[#allocation6 + $0x88] sm:$0xff]  ;;  %v229_v11 = vld [vmem:[#allocation6 + $0x90] sm:$0xff]  ;;  %s339_s19 = sld [smem:[#allocation2]]  ;;  %s727_s21 = sshll.u32 %s1356_s24, 3 }
  0x58   : > { %1171 = vsyncadd (%p1444_p1), [#allocation7], 4294950912  ;;  %v211_v2 = vld [vmem:[#allocation6] sm:$0xff]  ;;  %v873_v3 = vpack.c.bf16 %v228_v1, %v227_v0  ;;  %v212_v4 = vld [vmem:[#allocation6 + $0x8] sm:$0xff]  ;;  %s729_s4 = sshll.u32 %s1241_s2, 7  ;;  %s202_s26 = scalar_lea.vmem [#allocation8], %s727_s21 }
  0x59   : > { %v259_v5 = vld [vmem:[#allocation6 + $0x180] sm:$0xff]  ;;  %v260_v6 = vld [vmem:[#allocation6 + $0x188] sm:$0xff]  ;;  %v875_v7 = vpack.c.bf16 %v212_v4, %v211_v2  ;;  %v230_v13 = vld [vmem:[#allocation6 + $0x98] sm:$0xff]  ;;  %s637_s27 = sshll.u32 %s202_s26, 4  ;;  %s1383_s8 = scalar_lea.hbm %s1430_s3, %s729_s4  ;;  %s1385_s27 = int_to_ptr.vmem [resolvable:$true] %s637_s27 }
  0x5a   : > { %v905_v8 = vpack.c.bf16 %v260_v6, %v259_v5  ;;  %v243_v9 = vld [vmem:[#allocation6 + $0x100] sm:$0xff]  ;;  %v244_v10 = vld [vmem:[#allocation6 + $0x108] sm:$0xff]  ;;  %874 = vmatprep.subr.bf16.mxu0 %v873_v3  ;;  %v213_v14 = vld [vmem:[#allocation6 + $0x10] sm:$0xff]  ;;  %v877_v16 = vpack.c.bf16 %v230_v13, %v229_v11  ;;  %s624_s9 = scalar_lea.sflag [#allocation5], %s1356_s24  ;;  %s1120_s10 = scalar_lea.vmem %s1385_s27, 128 }
  0x5b   : > { %v907_v12 = vpack.c.bf16 %v244_v10, %v243_v9  ;;  %v214_v15 = vld [vmem:[#allocation6 + $0x18] sm:$0xff]  ;;  %876 = vmatpush3.bf16.msra.mxu0 %v875_v7  ;;  %v261_v18 = vld [vmem:[#allocation6 + $0x190] sm:$0xff]  ;;  %v231_v23 = vld [vmem:[#allocation6 + $0xa0] sm:$0xff]  ;;  %p1121_p4 = scmp.ne.s32.totalorder %s1385_s27, %s1120_s10  ;;  %s1196_s2 = smov [#allocation8]  }
  0x5c   : > { %906 = vmatprep.subr.bf16.mxu1 %v905_v8  ;;  %v879_v17 = vpack.c.bf16 %v214_v15, %v213_v14  ;;  %v262_v19 = vld [vmem:[#allocation6 + $0x198] sm:$0xff]  ;;  %v245_v20 = vld [vmem:[#allocation6 + $0x110] sm:$0xff]  ;;  %v232_v24 = vld [vmem:[#allocation6 + $0xa8] sm:$0xff]  ;;  %878 = vmatprep.subr.bf16.mxu0 %v877_v16  ;;  %s1124_s11 = sshll.u32 %s1196_s2, 4  ;;  %s1125_s11 = int_to_ptr.vmem [resolvable:$false] %s1124_s11 }
  0x5d   : > { %908 = vmatpush3.bf16.msra.mxu1 %v907_v12  ;;  %v909_v21 = vpack.c.bf16 %v262_v19, %v261_v18  ;;  %v246_v22 = vld [vmem:[#allocation6 + $0x118] sm:$0xff]  ;;  %v881_v26 = vpack.c.bf16 %v232_v24, %v231_v23  ;;  %v215_v27 = vld [vmem:[#allocation6 + $0x20] sm:$0xff]  ;;  %v216_v28 = vld [vmem:[#allocation6 + $0x28] sm:$0xff]  ;;  %p1122_p6 = pnand %p1121_p4, %p1311_p12  ;;  %s1126_s12 = scalar_lea.vmem %s1125_s11, 256 }
  0x5e   : > { %v911_v25 = vpack.c.bf16 %v246_v22, %v245_v20  ;;  %v263_v29 = vld [vmem:[#allocation6 + $0x1a0] sm:$0xff]  ;;  %v264_v30 = vld [vmem:[#allocation6 + $0x1a8] sm:$0xff]  ;;  %v883_v33 = vpack.c.bf16 %v216_v28, %v215_v27  ;;  %v233_v35 = vld [vmem:[#allocation6 + $0xb0] sm:$0xff]  ;;  %p1127_p10 = scmp.lt.s32.totalorder %s1385_s27, %s1125_s11  ;;  %p1128_p13 = scmp.lt.s32.totalorder %s1126_s12, %s1120_s10 }
  0x5f   : > { %910 = vmatprep.subr.bf16.mxu1 %v909_v21  ;;  %v247_v31 = vld [vmem:[#allocation6 + $0x120] sm:$0xff]  ;;  %v248_v32 = vld [vmem:[#allocation6 + $0x128] sm:$0xff]  ;;  %880 = vmatpush3.bf16.msra.mxu0 %v879_v17  ;;  %v913_v34 = vpack.c.bf16 %v264_v30, %v263_v29  ;;  %v234_v36 = vld [vmem:[#allocation6 + $0xb8] sm:$0xff]  ;;  %p1123_p8 = pneg %p1122_p6 }
  0x60   : > { %v217_v37 = vld [vmem:[#allocation6 + $0x30] sm:$0xff]  ;;  %882 = vmatprep.subr.bf16.mxu0 %v881_v26  ;;  %v915_v38 = vpack.c.bf16 %v248_v32, %v247_v31  ;;  %v885_v39 = vpack.c.bf16 %v234_v36, %v233_v35  ;;  %v218_v40 = vld [vmem:[#allocation6 + $0x38] sm:$0xff]  ;;  %v235_v46 = vld [vmem:[#allocation6 + $0xc0] sm:$0xff]  ;;  %p1129_p3 = por %p1128_p13, %p1127_p10 }
  0x61   : > { %912 = vmatpush3.bf16.msra.mxu1 %v911_v25  ;;  %v265_v41 = vld [vmem:[#allocation6 + $0x1b0] sm:$0xff]  ;;  %v266_v42 = vld [vmem:[#allocation6 + $0x1b8] sm:$0xff]  ;;  %v236_v47 = vld [vmem:[#allocation6 + $0xc8] sm:$0xff]  ;;  %v887_v48 = vpack.c.bf16 %v218_v40, %v217_v37 }
  0x62   : > { %914 = vmatprep.subr.bf16.mxu1 %v913_v34  ;;  %v917_v43 = vpack.c.bf16 %v266_v42, %v265_v41  ;;  %v249_v44 = vld [vmem:[#allocation6 + $0x130] sm:$0xff]  ;;  %v250_v45 = vld [vmem:[#allocation6 + $0x138] sm:$0xff]  ;;  %v267_v49 = vld [vmem:[#allocation6 + $0x1c0] sm:$0xff]  ;;  %v889_v52 = vpack.c.bf16 %v236_v47, %v235_v46  ;;  %p1130_p7 = pnand %p1129_p3, %p1123_p8 }
  0x63   : > { %884 = vmatpush3.bf16.msra.mxu0 %v883_v33  ;;  %v268_v50 = vld [vmem:[#allocation6 + $0x1c8] sm:$0xff]  ;;  %v919_v51 = vpack.c.bf16 %v250_v45, %v249_v44  ;;  %v219_v53 = vld [vmem:[#allocation6 + $0x40] sm:$0xff]  ;;  %v237_v58 = vld [vmem:[#allocation6 + $0xd0] sm:$0xff] }
  0x64   : > { %886 = vmatprep.subr.bf16.mxu0 %v885_v39  ;;  %v220_v54 = vld [vmem:[#allocation6 + $0x48] sm:$0xff]  ;;  %v251_v55 = vld [vmem:[#allocation6 + $0x140] sm:$0xff]  ;;  %v921_v56 = vpack.c.bf16 %v268_v50, %v267_v49  ;;  %v238_v59 = vld [vmem:[#allocation6 + $0xd8] sm:$0xff] }
  0x65   : > { %916 = vmatpush3.bf16.msra.mxu1 %v915_v38  ;;  %v252_v57 = vld [vmem:[#allocation6 + $0x148] sm:$0xff]  ;;  %v269_v60 = vld [vmem:[#allocation6 + $0x1d0] sm:$0xff]  ;;  %v270_v61 = vld [vmem:[#allocation6 + $0x1d8] sm:$0xff]  ;;  %v891_v62 = vpack.c.bf16 %v220_v54, %v219_v53  ;;  %v893_v0 = vpack.c.bf16 %v238_v59, %v237_v58 }
  0x66   : > { %918 = vmatprep.subr.bf16.mxu1 %v917_v43  ;;  %v923_v63 = vpack.c.bf16 %v252_v57, %v251_v55  ;;  %v221_v1 = vld [vmem:[#allocation6 + $0x50] sm:$0xff]  ;;  %v222_v2 = vld [vmem:[#allocation6 + $0x58] sm:$0xff]  ;;  %v925_v4 = vpack.c.bf16 %v270_v61, %v269_v60  ;;  %v239_v6 = vld [vmem:[#allocation6 + $0xe0] sm:$0xff] }
  0x67   : > { %888 = vmatpush3.bf16.msra.mxu0 %v887_v48  ;;  %v253_v3 = vld [vmem:[#allocation6 + $0x150] sm:$0xff]  ;;  %v254_v5 = vld [vmem:[#allocation6 + $0x158] sm:$0xff]  ;;  %v240_v7 = vld [vmem:[#allocation6 + $0xe8] sm:$0xff]  ;;  %v895_v10 = vpack.c.bf16 %v222_v2, %v221_v1 }
  0x68   : > { %890 = vmatprep.subr.bf16.mxu0 %v889_v52  ;;  %v271_v8 = vld [vmem:[#allocation6 + $0x1e0] sm:$0xff]  ;;  %v272_v9 = vld [vmem:[#allocation6 + $0x1e8] sm:$0xff]  ;;  %v927_v13 = vpack.c.bf16 %v254_v5, %v253_v3  ;;  %v897_v14 = vpack.c.bf16 %v240_v7, %v239_v6  ;;  %v241_v19 = vld [vmem:[#allocation6 + $0xf0] sm:$0xff] }
  0x69   : > { %920 = vmatpush3.bf16.msra.mxu1 %v919_v51  ;;  %v223_v11 = vld [vmem:[#allocation6 + $0x60] sm:$0xff]  ;;  %v224_v12 = vld [vmem:[#allocation6 + $0x68] sm:$0xff]  ;;  %v929_v18 = vpack.c.bf16 %v272_v9, %v271_v8  ;;  %v242_v20 = vld [vmem:[#allocation6 + $0xf8] sm:$0xff] }
  0x6a   : > { %922 = vmatprep.subr.bf16.mxu1 %v921_v56  ;;  %v255_v15 = vld [vmem:[#allocation6 + $0x160] sm:$0xff]  ;;  %v256_v16 = vld [vmem:[#allocation6 + $0x168] sm:$0xff]  ;;  %v206_v21 = vld [vmem:[%s1360_s6 + $0x18] sm:$0xff]  ;;  %v899_v24 = vpack.c.bf16 %v224_v12, %v223_v11  ;;  %v901_v26 = vpack.c.bf16 %v242_v20, %v241_v19 }
  0x6b   : > { %892 = vmatpush3.bf16.msra.mxu0 %v891_v62  ;;  %v204_v17 = vld [vmem:[%s1360_s6 + $0x8] sm:$0xff]  ;;  %v273_v22 = vld [vmem:[#allocation6 + $0x1f0] sm:$0xff]  ;;  %v274_v23 = vld [vmem:[#allocation6 + $0x1f8] sm:$0xff]  ;;  %475 = vmatprep.mubr.f32.mxu1 %v206_v21  ;;  %v931_v25 = vpack.c.bf16 %v256_v16, %v255_v15 }
  0x6c   : > { %894 = vmatprep.subr.bf16.mxu0 %v893_v0  ;;  %405 = vmatprep.mubr.f32.mxu0 %v204_v17  ;;  %v225_v27 = vld [vmem:[#allocation6 + $0x70] sm:$0xff]  ;;  %v226_v28 = vld [vmem:[#allocation6 + $0x78] sm:$0xff]  ;;  %v933_v30 = vpack.c.bf16 %v274_v23, %v273_v22  ;;  %v291_v32 = vld [vmem:[#allocation6 + $0x280] sm:$0xff] }
  0x6d   : > { %924 = vmatpush3.bf16.msra.mxu1 %v923_v63  ;;  %v257_v29 = vld [vmem:[#allocation6 + $0x170] sm:$0xff]  ;;  %v258_v31 = vld [vmem:[#allocation6 + $0x178] sm:$0xff]  ;;  %v292_v33 = vld [vmem:[#allocation6 + $0x288] sm:$0xff]  ;;  %v903_v36 = vpack.c.bf16 %v226_v28, %v225_v27 }
  0x6e   : > { %926 = vmatprep.subr.bf16.mxu1 %v925_v4  ;;  %v323_v34 = vld [vmem:[#allocation6 + $0x380] sm:$0xff]  ;;  %v324_v35 = vld [vmem:[#allocation6 + $0x388] sm:$0xff]  ;;  %v935_v37 = vpack.c.bf16 %v258_v31, %v257_v29  ;;  %v937_v38 = vpack.c.bf16 %v292_v33, %v291_v32  ;;  %v293_v44 = vld [vmem:[#allocation6 + $0x290] sm:$0xff] }
  0x6f   : > { %896 = vmatpush3.bf16.msra.mxu0 %v895_v10  ;;  %v275_v39 = vld [vmem:[#allocation6 + $0x200] sm:$0xff]  ;;  %v276_v40 = vld [vmem:[#allocation6 + $0x208] sm:$0xff]  ;;  %v969_v42 = vpack.c.bf16 %v324_v35, %v323_v34  ;;  %v294_v45 = vld [vmem:[#allocation6 + $0x298] sm:$0xff] }
  0x70   : > { %898 = vmatprep.subr.bf16.mxu0 %v897_v14  ;;  %v307_v41 = vld [vmem:[#allocation6 + $0x300] sm:$0xff]  ;;  %v308_v43 = vld [vmem:[#allocation6 + $0x308] sm:$0xff]  ;;  %v325_v46 = vld [vmem:[#allocation6 + $0x390] sm:$0xff]  ;;  %v939_v49 = vpack.c.bf16 %v276_v40, %v275_v39  ;;  %v941_v52 = vpack.c.bf16 %v294_v45, %v293_v44 }
  0x71   : > { %928 = vmatpush3.bf16.msra.mxu1 %v927_v13  ;;  %v326_v47 = vld [vmem:[#allocation6 + $0x398] sm:$0xff]  ;;  %v203_v48 = vld [vmem:[%s1360_s6] sm:$0xff]  ;;  %v205_v50 = vld [vmem:[%s1360_s6 + $0x10] sm:$0xff]  ;;  %v971_v51 = vpack.c.bf16 %v308_v43, %v307_v41 }
  0x72   : > { %930 = vmatprep.subr.bf16.mxu1 %v929_v18  ;;  %v277_v53 = vld [vmem:[#allocation6 + $0x210] sm:$0xff]  ;;  %v278_v54 = vld [vmem:[#allocation6 + $0x218] sm:$0xff]  ;;  %v973_v56 = vpack.c.bf16 %v326_v47, %v325_v46  ;;  %v295_v58 = vld [vmem:[#allocation6 + $0x2a0] sm:$0xff] }
  0x73   : > { %900 = vmatpush3.bf16.msra.mxu0 %v899_v24  ;;  %v309_v55 = vld [vmem:[#allocation6 + $0x310] sm:$0xff]  ;;  %v310_v57 = vld [vmem:[#allocation6 + $0x318] sm:$0xff]  ;;  %v296_v59 = vld [vmem:[#allocation6 + $0x2a8] sm:$0xff]  ;;  %v943_v62 = vpack.c.bf16 %v278_v54, %v277_v53 }
  0x74   : > { %902 = vmatprep.subr.bf16.mxu0 %v901_v26  ;;  %v327_v60 = vld [vmem:[#allocation6 + $0x3a0] sm:$0xff]  ;;  %v328_v61 = vld [vmem:[#allocation6 + $0x3a8] sm:$0xff]  ;;  %v975_v63 = vpack.c.bf16 %v310_v57, %v309_v55  ;;  %v945_v0 = vpack.c.bf16 %v296_v59, %v295_v58  ;;  %v297_v6 = vld [vmem:[#allocation6 + $0x2b0] sm:$0xff] }
  0x75   : > { %932 = vmatpush3.bf16.msra.mxu1 %v931_v25  ;;  %v279_v1 = vld [vmem:[#allocation6 + $0x220] sm:$0xff]  ;;  %v280_v2 = vld [vmem:[#allocation6 + $0x228] sm:$0xff]  ;;  %v977_v4 = vpack.c.bf16 %v328_v61, %v327_v60  ;;  %v298_v7 = vld [vmem:[#allocation6 + $0x2b8] sm:$0xff] }
  0x76   : > { %934 = vmatprep.subr.bf16.mxu1 %v933_v30  ;;  %v311_v3 = vld [vmem:[#allocation6 + $0x320] sm:$0xff]  ;;  %v312_v5 = vld [vmem:[#allocation6 + $0x328] sm:$0xff]  ;;  %v329_v8 = vld [vmem:[#allocation6 + $0x3b0] sm:$0xff]  ;;  %v947_v10 = vpack.c.bf16 %v280_v2, %v279_v1  ;;  %v949_v12 = vpack.c.bf16 %v298_v7, %v297_v6 }
  0x77   : > { %904 = vmatpush3.bf16.msra.mxu0 %v903_v36  ;;  %v330_v9 = vld [vmem:[#allocation6 + $0x3b8] sm:$0xff]  ;;  %v979_v11 = vpack.c.bf16 %v312_v5, %v311_v3  ;;  %v281_v13 = vld [vmem:[#allocation6 + $0x230] sm:$0xff]  ;;  %v299_v18 = vld [vmem:[#allocation6 + $0x2c0] sm:$0xff] }
  0x78   : > { %938 = vmatprep.subr.bf16.mxu0 %v937_v38  ;;  %v282_v14 = vld [vmem:[#allocation6 + $0x238] sm:$0xff]  ;;  %v313_v15 = vld [vmem:[#allocation6 + $0x330] sm:$0xff]  ;;  %v981_v16 = vpack.c.bf16 %v330_v9, %v329_v8  ;;  %v300_v19 = vld [vmem:[#allocation6 + $0x2c8] sm:$0xff]  ;;  %v340_v9 = vstv %s339_s19 }
  0x79   : > { %936 = vmatpush3.bf16.msra.mxu1 %v935_v37  ;;  %v314_v17 = vld [vmem:[#allocation6 + $0x338] sm:$0xff]  ;;  %v331_v20 = vld [vmem:[#allocation6 + $0x3c0] sm:$0xff]  ;;  %v332_v21 = vld [vmem:[#allocation6 + $0x3c8] sm:$0xff]  ;;  %v951_v22 = vpack.c.bf16 %v282_v14, %v281_v13  ;;  %v953_v26 = vpack.c.bf16 %v300_v19, %v299_v18 }
  0x7a   : > { %970 = vmatprep.subr.bf16.mxu1 %v969_v42  ;;  %406 = vmatmul.mubr.f32.vlgmr.msra.gmra.mrb[0].mxu0 %v203_v48  ;;  %v208_v23 = vld [vmem:[%s1360_s6 + $0x28] sm:$0xff]  ;;  %v210_v24 = vld [vmem:[%s1360_s6 + $0x38] sm:$0xff]  ;;  %v983_v25 = vpack.c.bf16 %v314_v17, %v313_v15  ;;  %v283_v27 = vld [vmem:[#allocation6 + $0x240] sm:$0xff]  ;;  %v985_v30 = vpack.c.bf16 %v332_v21, %v331_v20 }
  0x7b   : > { %940 = vmatpush3.bf16.msra.mxu0 %v939_v49  ;;  %v284_v28 = vld [vmem:[#allocation6 + $0x248] sm:$0xff]  ;;  %v315_v29 = vld [vmem:[#allocation6 + $0x340] sm:$0xff]  ;;  %v301_v32 = vld [vmem:[#allocation6 + $0x2d0] sm:$0xff]  ;;  %545 = vmatprep.mubr.f32.mxu0 %v208_v23 }
  0x7c   : > { %476 = vmatmul.mubr.f32.vlgmr.msra.gmra.mrb[0].mxu1 %v205_v50  ;;  %942 = vmatprep.subr.bf16.mxu0 %v941_v52  ;;  %v316_v31 = vld [vmem:[#allocation6 + $0x348] sm:$0xff]  ;;  %v302_v33 = vld [vmem:[#allocation6 + $0x2d8] sm:$0xff]  ;;  %v333_v34 = vld [vmem:[#allocation6 + $0x3d0] sm:$0xff]  ;;  %v955_v36 = vpack.c.bf16 %v284_v28, %v283_v27 }
  0x7d   : > { %972 = vmatpush3.bf16.msra.mxu1 %v971_v51  ;;  %v334_v35 = vld [vmem:[#allocation6 + $0x3d8] sm:$0xff]  ;;  %615 = vmatprep.mubr.f32.mxu1 %v210_v24  ;;  %v987_v37 = vpack.c.bf16 %v316_v31, %v315_v29  ;;  %v957_v38 = vpack.c.bf16 %v302_v33, %v301_v32  ;;  %v285_v39 = vld [vmem:[#allocation6 + $0x250] sm:$0xff]  ;;  %v303_v44 = vld [vmem:[#allocation6 + $0x2e0] sm:$0xff] }
  0x7e   : > { %974 = vmatprep.subr.bf16.mxu1 %v973_v56  ;;  %v286_v40 = vld [vmem:[#allocation6 + $0x258] sm:$0xff]  ;;  %v317_v41 = vld [vmem:[#allocation6 + $0x350] sm:$0xff]  ;;  %v989_v42 = vpack.c.bf16 %v334_v35, %v333_v34  ;;  %v304_v45 = vld [vmem:[#allocation6 + $0x2e8] sm:$0xff] }
  0x7f   : > { %944 = vmatpush3.bf16.msra.mxu0 %v943_v62  ;;  %v318_v43 = vld [vmem:[#allocation6 + $0x358] sm:$0xff]  ;;  %v335_v46 = vld [vmem:[#allocation6 + $0x3e0] sm:$0xff]  ;;  %v336_v47 = vld [vmem:[#allocation6 + $0x3e8] sm:$0xff]  ;;  %v959_v48 = vpack.c.bf16 %v286_v40, %v285_v39  ;;  %v961_v50 = vpack.c.bf16 %v304_v45, %v303_v44 }
  0x80   : > { %946 = vmatprep.subr.bf16.mxu0 %v945_v0  ;;  %v991_v49 = vpack.c.bf16 %v318_v43, %v317_v41  ;;  %v287_v51 = vld [vmem:[#allocation6 + $0x260] sm:$0xff]  ;;  %v288_v52 = vld [vmem:[#allocation6 + $0x268] sm:$0xff]  ;;  %v993_v54 = vpack.c.bf16 %v336_v47, %v335_v46  ;;  %v305_v56 = vld [vmem:[#allocation6 + $0x2f0] sm:$0xff] }
  0x81   : > { %976 = vmatpush3.bf16.msra.mxu1 %v975_v63  ;;  %v319_v53 = vld [vmem:[#allocation6 + $0x360] sm:$0xff]  ;;  %v320_v55 = vld [vmem:[#allocation6 + $0x368] sm:$0xff]  ;;  %v306_v57 = vld [vmem:[#allocation6 + $0x2f8] sm:$0xff]  ;;  %v963_v60 = vpack.c.bf16 %v288_v52, %v287_v51 }
  0x82   : > { %978 = vmatprep.subr.bf16.mxu1 %v977_v4  ;;  %v337_v58 = vld [vmem:[#allocation6 + $0x3f0] sm:$0xff]  ;;  %v338_v59 = vld [vmem:[#allocation6 + $0x3f8] sm:$0xff]  ;;  %v995_v61 = vpack.c.bf16 %v320_v55, %v319_v53  ;;  %v965_v62 = vpack.c.bf16 %v306_v57, %v305_v56  ;;  %v207_v6 = vld [vmem:[%s1360_s6 + $0x20] sm:$0xff] }
  0x83   : > { %948 = vmatpush3.bf16.msra.mxu0 %v947_v10  ;;  %v289_v63 = vld [vmem:[#allocation6 + $0x270] sm:$0xff]  ;;  %v290_v0 = vld [vmem:[#allocation6 + $0x278] sm:$0xff]  ;;  %v997_v1 = vpack.c.bf16 %v338_v59, %v337_v58 }
  0x84   : > { %950 = vmatprep.subr.bf16.mxu0 %v949_v12  ;;  %v321_v2 = vld [vmem:[#allocation6 + $0x370] sm:$0xff]  ;;  %v322_v3 = vld [vmem:[#allocation6 + $0x378] sm:$0xff]  ;;  %v967_v4 = vpack.c.bf16 %v290_v0, %v289_v63 }
  0x85   : > { %980 = vmatpush3.bf16.msra.mxu1 %v979_v11  ;;  %v999_v5 = vpack.c.bf16 %v322_v3, %v321_v2  ;;  %v209_v7 = vld [vmem:[%s1360_s6 + $0x30] sm:$0xff] }
  0x86   : > { %982 = vmatprep.subr.bf16.mxu1 %v981_v16 }
  0x87   : > { %952 = vmatpush3.bf16.msra.mxu0 %v951_v22 }
  0x88   : > { %954 = vmatprep.subr.bf16.mxu0 %v953_v26 }
  0x89   : > { %984 = vmatpush3.bf16.msra.mxu1 %v983_v25 }
  0x8a   : > { %986 = vmatprep.subr.bf16.mxu1 %v985_v30 }
  0x8b   : > { %956 = vmatpush3.bf16.msra.mxu0 %v955_v36 }
  0x8c   : > { %958 = vmatprep.subr.bf16.mxu0 %v957_v38 }
  0x8d   : > { %988 = vmatpush3.bf16.msra.mxu1 %v987_v37 }
  0x8e   : > { %990 = vmatprep.subr.bf16.mxu1 %v989_v42 }
  0x8f   : > { %960 = vmatpush3.bf16.msra.mxu0 %v959_v48 }
  0x90   : > { %962 = vmatprep.subr.bf16.mxu0 %v961_v50 }
  0x91   : > { %992 = vmatpush3.bf16.msra.mxu1 %v991_v49 }
  0x92   : > { %994 = vmatprep.subr.bf16.mxu1 %v993_v54 }
  0x93   : > { %964 = vmatpush3.bf16.msra.mxu0 %v963_v60 }
  0x94   : > { %966 = vmatprep.subr.bf16.mxu0 %v965_v62 }
  0x95   : > { %996 = vmatpush3.bf16.msra.mxu1 %v995_v61 }
  0x96   : > { %998 = vmatprep.subr.bf16.mxu1 %v997_v1 }
  0x97   : > { %968 = vmatpush3.bf16.msra.mxu0 %v967_v4 }
  0x99   : > { %1000 = vmatpush3.bf16.msra.mxu1 %v999_v5 }
  0x9a   : > { %546 = vmatmul.mubr.f32.vlgmr.msra.gmra.mrb[2].mxu0 %v207_v6 }
  0x9c   : > { %616 = vmatmul.mubr.f32.vlgmr.msra.gmra.mrb[2].mxu1 %v209_v7 }
 0x14d   : > { %v765_v8 = vpop.f32.mrb[0].mxu0 }
 0x14e   : > { %v766_v10 = vpop.f32.mrb[1].mxu0 }
 0x14f   : > { %v800_v11 = vpop.f32.mrb[0].mxu1  ;;  %v767_v12 = vadd.f32 %v766_v10, %v765_v8 }
 0x150   : > { %v801_v13 = vpop.f32.mrb[1].mxu1 }
 0x151   : > { %v802_v14 = vadd.f32 %v801_v13, %v800_v11  ;;  %v408_v15 = vadd.f32 %v767_v12, %v340_v9 }
 0x153   : > { %v478_v16 = vadd.f32 %v802_v14, %v408_v15 }
 0x16d   : > { %v835_v17 = vpop.f32.mrb[2].mxu0 }
 0x16e   : > { %v836_v18 = vpop.f32.mrb[3].mxu0 }
 0x16f   : > { %v870_v19 = vpop.f32.mrb[2].mxu1  ;;  %v837_v20 = vadd.f32 %v836_v18, %v835_v17 }
 0x170   : > { %v871_v21 = vpop.f32.mrb[3].mxu1 }
 0x171   : > { %v872_v22 = vadd.f32 %v871_v21, %v870_v19  ;;  %v548_v23 = vadd.f32 %v837_v20, %v478_v16 }
 0x173   : > { %v618_v24 = vadd.f32 %v872_v22, %v548_v23 }
 0x175   : > { %1060 = vtanh.f32 %v618_v24 }
 0x17f   : > { %v1061_v25 = vpop.eup %1060 }
 0x180   : > { %622 = vst [vmem:[%s202_s26] sm:$0xff] %v1061_v25 }
 0x181   : > { %1133 = shalt.err (!%p1130_p7)
}
 0x182   : > { %s1134_s22 = scalar_lea.hbm %s1383_s8, 128  ;;  %s1138_s24 = scalar_lea.hbm %s1430_s3, 256 }
 0x183   : > { %p1135_p9 = scmp.ne.s32.totalorder %s1383_s8, %s1134_s22  ;;  %p1139_p0 = scmp.lt.u32.totalorder %s1383_s8, %s1430_s3 }
 0x184   : > { %p1140_p11 = scmp.lt.u32.totalorder %s1138_s24, %s1134_s22  ;;  %p1142_p4 = scmp.lt.u32.totalorder %s1134_s22, %s1383_s8 }
 0x185   : > { %p1136_p2 = pnand %p1135_p9, %p1311_p12 }
 0x186   : > { %p1141_p1 = por %p1140_p11, %p1139_p0 }
 0x187   : > { %p1137_p5 = pneg %p1136_p2 }
 0x188   : > { %p1143_p6 = por %p1142_p4, %p1141_p1 }
 0x18a   : > { %p1144_p8 = pnand %p1143_p6, %p1137_p5 }
 0x18c   : > { %1147 = shalt.err (!%p1144_p8)
}
 0x18d   : > { %1007 = dma.vmem_to_hbm [thread:$0]  (%p1311_p12), %s1385_s27, 128, %s1383_s8, %s624_s9  }
 0x18e PF: > { %s649_s6 = sand.u32 1, %s1178_s14   ;;  %p1445_p10 = scmp.ne.s32.totalorder %s1435_s20, 0 }
 0x18f   : > { %p1446_p13 = scmp.ge.s32.totalorder %s1190_s17, 2  ;;  %s650_s19 = scalar_lea.sflag [#allocation5], %s649_s6 }
 0x191   : > { %p1018_p3 = pnand %p1446_p13, %p1445_p10 }
 0x193   : > { %1173 = dma.done.wait (!%p1018_p3), %s650_s19, 128  }
 0x194   : > { %1175 = vsyncadd (!%p1018_p3), %s650_s19, 4294967168  ;;  %p18_p7 = scmp.ge.s32.totalorder %s1276_s25, 4   ;;  %s1447_s14 = smov %s1182_s15 }
 0x195   : > { %s1448_s15 = smov %s1186_s16  ;;  %s1449_s16 = smov %s1307_s13 }
 0x196   : > { %s1450_s17 = smov %s1276_s25  ;;  %20 = sbr.rel (!%p18_p7) target bundleno = 8 (0x8), region = 81 }
 0x19d   :  { %655 = vsyncpa [#allocation4], 1 }
 0x19e   :  { %657 = vsyncpa [#allocation4 + $0x1], 1 }
 0x19f   :  { %658 = vsyncpa [#allocation7], 1 }
 0x1a0   :  { %659 = vsyncpa [#allocation5], 1 }
 0x1a1   :  { %661 = vsyncpa [#allocation5 + $0x1], 1 }

</bundles_post_ra>
